<compile_context>
chip_gen: v7x
topology: tpu7x:2x2x1
jax: 0.10.0
libtpu: 0.0.40
codegen_flags: <defaults>
</compile_context>

<pallas_src>
import functools

import jax
import jax.numpy as jnp
from jax.experimental import pallas as pl
from jax.experimental.pallas import tpu as pltpu


# ----------------------------------------------------------------------------
# Fast path: whole samples per block.  x block: (B, R, 128).
# ----------------------------------------------------------------------------
def _layernorm_kernel(x_ref, g_ref, b_ref, o_ref, *, eps: float, n: int):
    # x_ref: (B, R, 128)   g_ref, b_ref: (R, 128)   o_ref: (B, R, 128)
    x = x_ref[...].astype(jnp.float32)

    # Sublane-first reductions: the bulk of the reduction is VALU adds
    # (4 slots, slack); only one cross-lane (XLU) reduce per sample remains.
    r1 = jnp.sum(x, axis=1, keepdims=True)            # (B, 1, 128)  VALU
    r2 = jnp.sum(x * x, axis=1, keepdims=True)        # (B, 1, 128)  VALU
    s1 = jnp.sum(r1, axis=2, keepdims=True)           # (B, 1, 1)    XLU
    s2 = jnp.sum(r2, axis=2, keepdims=True)           # (B, 1, 1)    XLU

    mean = s1 * (1.0 / n)
    # Unbiased variance (torch.std default): (sum(x^2) - n*mean^2) / (n - 1).
    # NOTE: single-pass formula can lose precision when |mean| >> std; kept
    # for bandwidth (one data sweep), clamped at 0.
    var = (s2 - s1 * mean) * (1.0 / max(n - 1, 1))
    denom = jnp.sqrt(jnp.maximum(var, 0.0)) + eps

    # EUP-routed approx reciprocal + one Newton step (operand is (B,1,1), so
    # the refinement costs nothing and restores full f32 accuracy).
    inv = pl.reciprocal(denom, approx=True)
    inv = inv * (2.0 - denom * inv)

    x_hat = (x - mean) * inv
    o_ref[...] = (x_hat * g_ref[...][None, :, :] + b_ref[...][None, :, :]).astype(o_ref.dtype)


# ----------------------------------------------------------------------------
# R-tiled two-pass path: a single sample does not fit the block budget.
# Grid = (N, 2 * num_r_tiles): first num_r_tiles steps accumulate per-lane
# partial sums in VMEM scratch, last num_r_tiles steps normalize and store.
# ----------------------------------------------------------------------------
def _layernorm_tiled_kernel(x_ref, g_ref, b_ref, o_ref, s1_ref, s2_ref,
                            *, eps: float, n: int, num_r_tiles: int):
    k = pl.program_id(1)

    @pl.when(k == 0)
    def _():
        s1_ref[...] = jnp.zeros_like(s1_ref)
        s2_ref[...] = jnp.zeros_like(s2_ref)

    x = x_ref[...].astype(jnp.float32)                 # (1, Rt, 128)

    @pl.when(k < num_r_tiles)
    def _():
        # Pass 0: per-lane partial sums only (pure VALU, no XLU).
        s1_ref[...] += jnp.sum(x, axis=1)              # (1, 128)
        s2_ref[...] += jnp.sum(x * x, axis=1)          # (1, 128)

    @pl.when(k >= num_r_tiles)
    def _():
        # Pass 1: finalize stats (one lane reduce, recomputed per tile - cheap)
        # and write the normalized tile.
        s1 = jnp.sum(s1_ref[...], keepdims=True)       # (1, 1)
        s2 = jnp.sum(s2_ref[...], keepdims=True)       # (1, 1)
        mean = s1 * (1.0 / n)
        var = (s2 - s1 * mean) * (1.0 / max(n - 1, 1))
        denom = jnp.sqrt(jnp.maximum(var, 0.0)) + eps
        inv = pl.reciprocal(denom, approx=True)
        inv = inv * (2.0 - denom * inv)
        x_hat = (x - mean) * inv
        o_ref[...] = (x_hat * g_ref[...][None, :, :] + b_ref[...][None, :, :]).astype(o_ref.dtype)


def layer_norm(x, gamma, beta, eps=1e-08, *, block_budget_bytes=None):
    """x: (N, C, H, W); gamma, beta: (C,). Returns (N, C, H, W)."""
    N, C, H, W = x.shape
    F = C * H * W
    R = pl.cdiv(F, 128)
    F_pad = R * 128
    itemsize = jnp.dtype(x.dtype).itemsize

    # --- hardware-aware VMEM sizing ------------------------------------------
    try:
        vmem_cap = int(pltpu.get_tpu_info().vmem_capacity_bytes)
    except Exception:
        vmem_cap = 64 * 1024 * 1024                    # conservative (v7x-sized)
    if vmem_cap >= 96 * 1024 * 1024:                   # v5e / v6e (128 MiB)
        default_budget = 8 * 1024 * 1024
        vmem_limit = 48 * 1024 * 1024
    else:                                              # v7x (64 MiB physical)
        default_budget = 4 * 1024 * 1024
        vmem_limit = 32 * 1024 * 1024
    block_budget = default_budget if block_budget_bytes is None else int(block_budget_bytes)

    # --- per-element gamma/beta in the same lane-dense (R, 128) layout -------
    g_full = jnp.broadcast_to(gamma.astype(jnp.float32)[:, None], (C, H * W)).reshape(F)
    b_full = jnp.broadcast_to(beta.astype(jnp.float32)[:, None], (C, H * W)).reshape(F)
    if F_pad != F:
        # TODO(synk): a masked tail store would avoid this (rare) padding pass.
        g_full = jnp.pad(g_full, (0, F_pad - F))
        b_full = jnp.pad(b_full, (0, F_pad - F))
    g2 = g_full.reshape(R, 128)
    b2 = b_full.reshape(R, 128)

    # Flatten each sample (metadata-only when F % 128 == 0).
    xf = x.reshape(N, F)
    if F_pad != F:
        xf = jnp.pad(xf, ((0, 0), (0, F_pad - F)))     # zeros don't perturb sums

    # --- block sizing ---------------------------------------------------------
    bytes_per_sample = F_pad * 4                       # f32 working-set per sample
    in_out_bytes = F_pad * itemsize                    # x / out block bytes per sample
    param_bytes = 4 * F_pad * 4                        # gamma+beta, 2 pipeline bufs each
    # 2x double-buffered in + 2x out + resident params + ~2 f32 body temporaries
    b_fit_budget = block_budget // bytes_per_sample
    b_fit_vmem = max(0, vmem_limit - param_bytes) // (4 * in_out_bytes + 2 * bytes_per_sample)
    B_max = min(b_fit_budget, b_fit_vmem)

    if B_max >= 1:
        # ---- fast path: whole samples per block -----------------------------
        b_cap = max(1, min(N, B_max))
        if N >= 2:
            b_cap = min(b_cap, pl.cdiv(N, 2))          # G >= 2: both v7x TCs busy
        # Prefer B dividing N (no batch-padding HBM pass).
        B = 1
        for d in range(b_cap, 0, -1):
            if N % d == 0:
                B = d
                break
        N_pad = N
        if b_cap >= 8 and B * 8 <= b_cap:
            # Divisor is pathologically small (e.g. prime N): minimal padding
            # beats thousands of tiny grid steps.
            g_target = pl.cdiv(N, b_cap)
            B = pl.cdiv(N, g_target)
            N_pad = g_target * B
            xf = jnp.pad(xf, ((0, N_pad - N), (0, 0)))
        G = N_pad // B
        x3 = xf.reshape(N_pad, R, 128)

        kernel = functools.partial(_layernorm_kernel, eps=float(eps), n=F)
        out = pl.pallas_call(
            kernel,
            out_shape=jax.ShapeDtypeStruct((N_pad, R, 128), x.dtype),
            grid_spec=pltpu.PrefetchScalarGridSpec(
                num_scalar_prefetch=0,
                grid=(G,),
                in_specs=[
                    pl.BlockSpec((B, R, 128), lambda i: (i, 0, 0)),
                    # TODO(synk): pipeline_mode=pl.Buffered(1) would drop the
                    # redundant second buffer of these resident params.
                    pl.BlockSpec((R, 128), lambda i: (0, 0)),
                    pl.BlockSpec((R, 128), lambda i: (0, 0)),
                ],
                out_specs=pl.BlockSpec((B, R, 128), lambda i: (i, 0, 0)),
            ),
            compiler_params=pltpu.CompilerParams(
                dimension_semantics=("parallel",),
                vmem_limit_bytes=vmem_limit,
            ),
            cost_estimate=pl.CostEstimate(
                flops=8 * N_pad * F_pad,
                transcendentals=2 * N_pad,
                bytes_accessed=2 * N_pad * F_pad * itemsize + 2 * F_pad * 4,
            ),
        )(x3, g2, b2)
        if N_pad != N:
            out = out[:N]
        R_out = R
    else:
        # ---- R-tiled two-pass path: one sample exceeds the block budget -----
        rt_rows = max(8, (block_budget // (128 * 4)) // 8 * 8)
        rt_rows = min(rt_rows, ((R + 7) // 8) * 8)
        num_r_tiles = pl.cdiv(R, rt_rows)
        R_out = num_r_tiles * rt_rows
        if R_out != R:
            xf = jnp.pad(xf, ((0, 0), (0, (R_out - R) * 128)))
            g2 = jnp.pad(g2, ((0, R_out - R), (0, 0)))
            b2 = jnp.pad(b2, ((0, R_out - R), (0, 0)))
        x3 = xf.reshape(N, R_out, 128)

        kernel = functools.partial(_layernorm_tiled_kernel, eps=float(eps),
                                   n=F, num_r_tiles=num_r_tiles)
        out = pl.pallas_call(
            kernel,
            out_shape=jax.ShapeDtypeStruct((N, R_out, 128), x.dtype),
            grid_spec=pltpu.PrefetchScalarGridSpec(
                num_scalar_prefetch=0,
                grid=(N, 2 * num_r_tiles),
                in_specs=[
                    pl.BlockSpec((1, rt_rows, 128),
                                 lambda i, k: (i, k % num_r_tiles, 0)),
                    pl.BlockSpec((rt_rows, 128),
                                 lambda i, k: (k % num_r_tiles, 0)),
                    pl.BlockSpec((rt_rows, 128),
                                 lambda i, k: (k % num_r_tiles, 0)),
                ],
                # Output block index held at (i, 0) during pass 0 (no garbage
                # writeback); advances only during pass 1, after it is written.
                out_specs=pl.BlockSpec(
                    (1, rt_rows, 128),
                    lambda i, k: (i, jnp.maximum(k - num_r_tiles, 0), 0)),
                scratch_shapes=[pltpu.VMEM((1, 128), jnp.float32),
                                pltpu.VMEM((1, 128), jnp.float32)],
            ),
            compiler_params=pltpu.CompilerParams(
                dimension_semantics=("parallel", "arbitrary"),
                vmem_limit_bytes=vmem_limit,
            ),
            cost_estimate=pl.CostEstimate(
                flops=8 * N * R_out * 128,
                transcendentals=2 * N,
                bytes_accessed=3 * N * R_out * 128 * itemsize + 2 * R_out * 128 * 4,
            ),
        )(x3, g2, b2)
        if R_out != R:
            out = out[:, :R, :]

    out2 = out.reshape(N, F_pad)
    if F_pad != F:
        out2 = out2[:, :F]
    return out2.reshape(N, C, H, W)


def _reference(x, gamma, beta, eps=1e-08):
    N = x.shape[0]
    flat = x.reshape(N, -1)
    mean = flat.mean(axis=1).reshape(N, 1, 1, 1)
    std = jnp.std(flat, axis=1, ddof=1).reshape(N, 1, 1, 1)
    xn = (x - mean) / (std + eps)
    return xn * gamma.reshape(1, -1, 1, 1) + beta.reshape(1, -1, 1, 1)


if __name__ == "__main__":
    key = jax.random.PRNGKey(0)
    kx, kg, kx2, kg2 = jax.random.split(key, 4)

    # --- fast path (whole-sample blocks) -------------------------------------
    N, C, H, W = 2, 4, 16, 16
    x = jax.random.normal(kx, (N, C, H, W), dtype=jnp.float32)
    # Module init: gamma ~ uniform(0, 1), beta = zeros.
    gamma = jax.random.uniform(kg, (C,), dtype=jnp.float32)
    beta = jnp.zeros((C,), dtype=jnp.float32)

    out = jax.block_until_ready(layer_norm(x, gamma, beta, eps=1e-08))
    ref = _reference(x, gamma, beta, eps=1e-08)
    assert out.shape == (N, C, H, W)
    assert jnp.allclose(out, ref, atol=1e-5, rtol=1e-5), "fast path mismatch"

    # --- R-tiled two-pass path (forced via a tiny block budget) --------------
    C2 = 8
    x2 = jax.random.normal(kx2, (N, C2, H, W), dtype=jnp.float32)
    gamma2 = jax.random.uniform(kg2, (C2,), dtype=jnp.float32)
    beta2 = jnp.zeros((C2,), dtype=jnp.float32)
    out2 = jax.block_until_ready(
        layer_norm(x2, gamma2, beta2, eps=1e-08, block_budget_bytes=8 * 128 * 4))
    ref2 = _reference(x2, gamma2, beta2, eps=1e-08)
    assert out2.shape == (N, C2, H, W)
    assert jnp.allclose(out2, ref2, atol=1e-5, rtol=1e-5), "tiled path mismatch"

    print("KERNEL_OK")
</pallas_src>

<mosaic_0001>
module attributes {stable_mosaic.version = 11 : i64} {
  func.func @_layernorm_kernel(%arg0: i32, %arg1: memref<1x8x128xf32, #tpu.memory_space<vmem>>, %arg2: memref<8x128xf32, #tpu.memory_space<vmem>>, %arg3: memref<8x128xf32, #tpu.memory_space<vmem>>, %arg4: memref<1x8x128xf32, #tpu.memory_space<vmem>>) attributes {dimension_semantics = [#tpu.dimension_semantics<parallel>], iteration_bounds = array<i64: 2>, scalar_prefetch = 0 : i64, scratch_operands = 0 : i64, tpu.core_type = #tpu.core_type<tc>, window_params = [{transform_indices = @transform_0, window_bounds = array<i64: 1, 8, 128>}, {pipeline_mode = #tpu.pipeline_mode<synchronous>, transform_indices = @transform_1, window_bounds = array<i64: 8, 128>}, {pipeline_mode = #tpu.pipeline_mode<synchronous>, transform_indices = @transform_2, window_bounds = array<i64: 8, 128>}, {transform_indices = @transform_3, window_bounds = array<i64: 1, 8, 128>}]} {
    %c0 = arith.constant 0 : index
    %c0_0 = arith.constant 0 : index
    %c0_1 = arith.constant 0 : index
    %0 = vector.load %arg1[%c0, %c0_0, %c0_1] : memref<1x8x128xf32, #tpu.memory_space<vmem>>, vector<1x8x128xf32>
    %cst = arith.constant dense<0.000000e+00> : vector<1x128xf32>
    %1 = vector.multi_reduction <add>, %0, %cst [1] : vector<1x8x128xf32> to vector<1x128xf32>
    %2 = vector.shape_cast %1 : vector<1x128xf32> to vector<1x1x128xf32>
    %3 = arith.mulf %0, %0 : vector<1x8x128xf32>
    %cst_2 = arith.constant dense<0.000000e+00> : vector<1x128xf32>
    %4 = vector.multi_reduction <add>, %3, %cst_2 [1] : vector<1x8x128xf32> to vector<1x128xf32>
    %5 = vector.shape_cast %4 : vector<1x128xf32> to vector<1x1x128xf32>
    %cst_3 = arith.constant dense<0.000000e+00> : vector<1x1xf32>
    %6 = vector.multi_reduction <add>, %2, %cst_3 [2] : vector<1x1x128xf32> to vector<1x1xf32>
    %7 = vector.shape_cast %6 : vector<1x1xf32> to vector<1x1x1xf32>
    %cst_4 = arith.constant dense<0.000000e+00> : vector<1x1xf32>
    %8 = vector.multi_reduction <add>, %5, %cst_4 [2] : vector<1x1x128xf32> to vector<1x1xf32>
    %9 = vector.shape_cast %8 : vector<1x1xf32> to vector<1x1x1xf32>
    %cst_5 = arith.constant 9.765625E-4 : f32
    %10 = vector.broadcast %cst_5 : f32 to vector<1x1x1xf32>
    %11 = arith.mulf %7, %10 : vector<1x1x1xf32>
    %12 = arith.mulf %7, %11 : vector<1x1x1xf32>
    %13 = arith.subf %9, %12 : vector<1x1x1xf32>
    %cst_6 = arith.constant 9.77517105E-4 : f32
    %14 = vector.broadcast %cst_6 : f32 to vector<1x1x1xf32>
    %15 = arith.mulf %13, %14 : vector<1x1x1xf32>
    %cst_7 = arith.constant 0.000000e+00 : f32
    %16 = vector.broadcast %cst_7 : f32 to vector<1x1x1xf32>
    %17 = arith.maximumf %15, %16 : vector<1x1x1xf32>
    %18 = math.sqrt %17 : vector<1x1x1xf32>
    %cst_8 = arith.constant 9.99999993E-9 : f32
    %19 = vector.broadcast %cst_8 : f32 to vector<1x1x1xf32>
    %20 = arith.addf %18, %19 : vector<1x1x1xf32>
    %21 = tpu.reciprocal %20 {approx = true} : vector<1x1x1xf32> -> vector<1x1x1xf32>
    %22 = arith.mulf %20, %21 : vector<1x1x1xf32>
    %cst_9 = arith.constant 2.000000e+00 : f32
    %23 = vector.broadcast %cst_9 : f32 to vector<1x1x1xf32>
    %24 = arith.subf %23, %22 : vector<1x1x1xf32>
    %25 = arith.mulf %21, %24 : vector<1x1x1xf32>
    %26 = vector.broadcast %11 : vector<1x1x1xf32> to vector<1x8x128xf32>
    %27 = arith.subf %0, %26 : vector<1x8x128xf32>
    %28 = vector.broadcast %25 : vector<1x1x1xf32> to vector<1x8x128xf32>
    %29 = arith.mulf %27, %28 : vector<1x8x128xf32>
    %c0_10 = arith.constant 0 : index
    %c0_11 = arith.constant 0 : index
    %30 = vector.load %arg2[%c0_10, %c0_11] : memref<8x128xf32, #tpu.memory_space<vmem>>, vector<8x128xf32>
    %31 = vector.shape_cast %30 : vector<8x128xf32> to vector<1x8x128xf32>
    %32 = arith.mulf %29, %31 : vector<1x8x128xf32>
    %c0_12 = arith.constant 0 : index
    %c0_13 = arith.constant 0 : index
    %33 = vector.load %arg3[%c0_12, %c0_13] : memref<8x128xf32, #tpu.memory_space<vmem>>, vector<8x128xf32>
    %34 = vector.shape_cast %33 : vector<8x128xf32> to vector<1x8x128xf32>
    %35 = arith.addf %32, %34 : vector<1x8x128xf32>
    %c0_14 = arith.constant 0 : index
    %c0_15 = arith.constant 0 : index
    %c0_16 = arith.constant 0 : index
    %36 = vector.load %arg4[%c0_14, %c0_15, %c0_16] : memref<1x8x128xf32, #tpu.memory_space<vmem>>, vector<1x8x128xf32>
    tpu.vector_store %arg4[%c0_14, %c0_15, %c0_16], %35 {strides = array<i32>} : memref<1x8x128xf32, #tpu.memory_space<vmem>>, vector<1x8x128xf32>,
    return
  }
  func.func @transform_0(%arg0: i32) -> (i32, i32, i32) {
    %c0_i32 = arith.constant 0 : i32
    %c0_i32_0 = arith.constant 0 : i32
    %c0_i32_1 = arith.constant 0 : i32
    return %arg0, %c0_i32, %c0_i32_0 : i32, i32, i32
  }
  func.func @transform_1(%arg0: i32) -> (i32, i32) {
    %c0_i32 = arith.constant 0 : i32
    %c0_i32_0 = arith.constant 0 : i32
    %c0_i32_1 = arith.constant 0 : i32
    return %c0_i32, %c0_i32_0 : i32, i32
  }
  func.func @transform_2(%arg0: i32) -> (i32, i32) {
    %c0_i32 = arith.constant 0 : i32
    %c0_i32_0 = arith.constant 0 : i32
    %c0_i32_1 = arith.constant 0 : i32
    return %c0_i32, %c0_i32_0 : i32, i32
  }
  func.func @transform_3(%arg0: i32) -> (i32, i32, i32) {
    %c0_i32 = arith.constant 0 : i32
    %c0_i32_0 = arith.constant 0 : i32
    %c0_i32_1 = arith.constant 0 : i32
    return %arg0, %c0_i32, %c0_i32_0 : i32, i32, i32
  }
}

</mosaic_0001>

<bundles_post_ra>
// kernel: tpu_custom_call.1
= control target key start
LH: loop header
LB: loop body
LE: loop exit
PB: predicated region body
PF: predicated region fallthrough
CT: control target
= control target key end

     0   :  { %8 = vsyncpa [#allocation3], 0  ;;  %s854_s0 = inlined_call_operand.hbm [shape: f32[2,8,128], index: 0, kind: input, shape index: {}]   ;;  %s855_s1 = inlined_call_operand.hbm [shape: f32[8,128], index: 1, kind: input, shape index: {}]   ;;  %s856_s2 = inlined_call_operand.hbm [shape: f32[8,128], index: 2, kind: input, shape index: {}]   ;;  %s857_s3 = inlined_call_operand.hbm [shape: f32[2,8,128], index: 3, kind: output, shape index: {}]  }
   0x1   :  { %10 = vsyncpa [#allocation3 + $0x1], 0 }
   0x2   :  { %11 = vsyncpa [#allocation6], 0 }
   0x3   :  { %12 = vsyncpa [#allocation4], 0 }
   0x4   :  { %14 = vsyncpa [#allocation4 + $0x1], 0  ;;  %s625_s12 = smov 0   ;;  %s627_s13 = smov 0  }
   0x5   :  { %s629_s14 = smov 0   ;;  %s631_s15 = smov 0  }
   0x6 LB: > { %s646_s16 = sadd.s32 4294967295, %s599_s15   ;;  %s356_s17 = sadd.s32 4294967294, %s599_s15   ;;  %s599_s15 = sphi %s631_s15, %s877_s15   ;;  %s595_s14 = sphi %s629_s14, %s876_s14   ;;  %s591_s13 = sphi %s627_s13, %s875_s13   ;;  %s587_s12 = sphi %s625_s12, %s874_s12  }
   0x7   : > { %p40_p0 = scmp.ne.s32.totalorder %s591_s13, %s587_s12  ;;  %p858_p1 = scmp.eq.s32.totalorder %s646_s16, 0 }
   0x8   : > { %p112_p3 = scmp.eq.s32.totalorder %s356_s17, 1  ;;  %p357_p5 = scmp.ge.s32.totalorder %s599_s15, 1 }
   0x9   : > { %p655_p4 = por %p858_p1, %p40_p0  ;;  %p119_p7 = scmp.lt.s32.totalorder %s599_s15, 3 }
   0xa   : > { %p660_p6 = por %p112_p3, %p40_p0  ;;  %s601_s21 = smov [#allocation5]  }
   0xb   : > { %s861_s18 = scalar_select %p655_p4, 1, 0 }
   0xc   : > { %s862_s19 = scalar_select %p660_p6, 1, 0 }
   0xd   : > { %p665_p8 = pnand %p357_p5, %p119_p7  ;;  %s132_s22 = sshll.u32 %s601_s21, 4  ;;  %s133_s22 = int_to_ptr.vmem [resolvable:$true] %s132_s22 }
   0xe   : > { %s602_s23 = smov [#allocation7]   ;;  %s681_s26 = sadd.s32 1, %s599_s15  }
   0xf   : > { %s863_s20 = scalar_select %p665_p8, 1, 0 }
  0x10   : > { %p384_p10 = pneg %p665_p8  ;;  %s143_s24 = sshll.u32 %s602_s23, 4  ;;  %s678_s24 = int_to_ptr.vmem [resolvable:$true] %s143_s24 }
  0x11   : > { %s24_s27 = ssub.s32 %s599_s15, %s681_s26  ;;  %s443_s30 = scalar_lea.hbm %s855_s1, 128 }
  0x12   : > { %p674_p11 = pnand %p384_p10, %p858_p1  ;;  %p444_p12 = scmp.ne.s32.totalorder %s855_s1, %s443_s30 }
  0x13   : > { %p450_p5 = scmp.lt.u32.totalorder %s443_s30, %s855_s1 }
  0x14   : > { %p445_p13 = pneg %p674_p11 }
  0x16   : > { %p446_p0 = pnand %p445_p13, %p444_p12 }
  0x18   : > { %p447_p3 = pneg %p446_p0 }
  0x1a   : > { %p452_p7 = pnand %p450_p5, %p447_p3 }
  0x1c   : > { %455 = shalt.err (!%p452_p7)
}
  0x1d   : > { %s456_s8 = scalar_lea.vmem %s133_s22, 128  ;;  %p464_p2 = scmp.lt.s32.totalorder %s133_s22, %s133_s22 }
  0x1e   : > { %p457_p10 = scmp.ne.s32.totalorder %s133_s22, %s456_s8  ;;  %p465_p6 = scmp.lt.s32.totalorder %s456_s8, %s456_s8 }
  0x20   : > { %p459_p9 = pnand %p457_p10, %p445_p13  ;;  %p466_p4 = por %p465_p6, %p464_p2 }
  0x22   : > { %p460_p1 = pneg %p459_p9 }
  0x24   : > { %p467_p8 = pnand %p466_p4, %p460_p1 }
  0x26   : > { %470 = shalt.err (!%p467_p8)
}
  0x27   : > { %387 = dma.hbm_to_vmem [thread:$0]  (!%p674_p11), %s855_s1, 128, %s133_s22, [#allocation6]  }
  0x28   : > { %s471_s21 = scalar_lea.hbm %s856_s2, 128 }
  0x29   : > { %p472_p9 = scmp.ne.s32.totalorder %s856_s2, %s471_s21  ;;  %p478_p4 = scmp.lt.u32.totalorder %s471_s21, %s856_s2 }
  0x2b   : > { %p474_p2 = pnand %p472_p9, %p445_p13 }
  0x2d   : > { %p475_p1 = pneg %p474_p2 }
  0x2f   : > { %p480_p6 = pnand %p478_p4, %p475_p1 }
  0x31   : > { %483 = shalt.err (!%p480_p6)
}
  0x32   : > { %s484_s22 = scalar_lea.vmem %s678_s24, 128  ;;  %p492_p3 = scmp.lt.s32.totalorder %s678_s24, %s678_s24 }
  0x33   : > { %p485_p8 = scmp.ne.s32.totalorder %s678_s24, %s484_s22  ;;  %p493_p5 = scmp.lt.s32.totalorder %s484_s22, %s484_s22 }
  0x35   : > { %p487_p12 = pnand %p485_p8, %p445_p13  ;;  %p494_p7 = por %p493_p5, %p492_p3 }
  0x37   : > { %p488_p0 = pneg %p487_p12 }
  0x39   : > { %p495_p10 = pnand %p494_p7, %p488_p0 }
  0x3b   : > { %498 = shalt.err (!%p495_p10)
}
  0x3c   : > { %390 = dma.hbm_to_vmem [thread:$0]  (!%p674_p11), %s856_s2, 128, %s678_s24, [#allocation6]  }
  0x3d   : > { %p25_p13 = scmp.eq.s32.totalorder %s24_s27, 0  ;;  %s27_s6 = sadd.s32 1, %s595_s14 }
  0x3e   : > { %p34_p9 = scmp.ne.s32.totalorder %s595_s14, %s591_s13  ;;  %p35_p2 = scmp.eq.s32.totalorder %s599_s15, 0 }
  0x3f   : > { %s740_s25 = scalar_select %p25_p13, %s595_s14, %s27_s6  }
  0x40   : > { %p36_p1 = por %p35_p2, %p34_p9  ;;  %p865_p4 = scmp.eq.s32.totalorder %s646_s16, 1 }
  0x41   : > { %p401_p8 = scmp.lt.s32.totalorder %s599_s15, 2  ;;  %s154_s8 = sand.u32 1, %s595_s14  }
  0x42   : > { %p744_p6 = por %p865_p4, %p34_p9  ;;  %s361_s9 = sshll.u32 %s154_s8, 3 }
  0x43   : > { %s362_s10 = sshll.u32 %s599_s15, 7  ;;  %s158_s27 = scalar_lea.vmem [#allocation2], %s361_s9 }
  0x44   : > { %s754_s24 = scalar_lea.hbm %s854_s0, %s362_s10  ;;  %s165_s21 = sshll.u32 %s158_s27, 4  ;;  %s756_s21 = int_to_ptr.vmem [resolvable:$true] %s165_s21 }
  0x45   : > { %p758_p11 = pnand %p401_p8, %p36_p1  ;;  %s155_s28 = scalar_lea.sflag [#allocation3], %s154_s8 }
  0x46   : > { %s499_s29 = scalar_lea.hbm %s754_s24, 128  ;;  %s504_s4 = scalar_lea.hbm %s854_s0, 256 }
  0x47   : > { %p500_p12 = scmp.ne.s32.totalorder %s754_s24, %s499_s29  ;;  %p501_p0 = pneg %p758_p11 }
  0x48   : > { %p505_p7 = scmp.lt.u32.totalorder %s754_s24, %s854_s0  ;;  %p506_p10 = scmp.lt.u32.totalorder %s504_s4, %s499_s29 }
  0x49   : > { %p502_p3 = pnand %p501_p0, %p500_p12  ;;  %p508_p9 = scmp.lt.u32.totalorder %s499_s29, %s754_s24 }
  0x4a   : > { %p507_p13 = por %p506_p10, %p505_p7 }
  0x4b   : > { %p503_p5 = pneg %p502_p3 }
  0x4c   : > { %p509_p2 = por %p508_p9, %p507_p13 }
  0x4e   : > { %p510_p1 = pnand %p509_p2, %p503_p5 }
  0x50   : > { %513 = shalt.err (!%p510_p1)
}
  0x51   : > { %s514_s8 = scalar_lea.vmem %s756_s21, 128  ;;  %s603_s9 = smov [#allocation2]  }
  0x52   : > { %p515_p4 = scmp.ne.s32.totalorder %s756_s21, %s514_s8  ;;  %s519_s10 = sshll.u32 %s603_s9, 4  ;;  %s520_s10 = int_to_ptr.vmem [resolvable:$false] %s519_s10 }
  0x53   : > { %s521_s11 = scalar_lea.vmem %s520_s10, 256  ;;  %p522_p3 = scmp.lt.s32.totalorder %s756_s21, %s520_s10 }
  0x54   : > { %p517_p8 = pnand %p515_p4, %p501_p0  ;;  %p523_p7 = scmp.lt.s32.totalorder %s521_s11, %s514_s8 }
  0x56   : > { %p518_p12 = pneg %p517_p8  ;;  %p524_p10 = por %p523_p7, %p522_p3 }
  0x58   : > { %p525_p13 = pnand %p524_p10, %p518_p12 }
  0x5a   : > { %528 = shalt.err (!%p525_p13)
}
  0x5b   : > { %394 = dma.hbm_to_vmem [thread:$0]  (!%p758_p11), %s754_s24, 128, %s756_s21, %s155_s28  }
  0x5c   : > { %p868_p5 = scmp.ne.s32.totalorder %s863_s20, 0 }
  0x5d   : > { %s790_s17 = sand.u32 (!%p868_p5), 1, %s591_s13   ;;  %p869_p0 = scmp.ne.s32.totalorder (!%p868_p5), %s861_s18, 0 }
  0x5e   : > { %174 = sbr.rel (%p868_p5) target bundleno = 324 (0x144), region = 32  ;;  %s364_s27 = sshll.u32 (!%p868_p5), %s790_s17, 3 }
  0x5f   : > { %s177_s29 = scalar_lea.sflag (!%p868_p5), [#allocation3], %s790_s17  ;;  %s180_s30 = scalar_lea.vmem (!%p868_p5), [#allocation2], %s364_s27 }
  0x65   : > { %574 = dma.done.wait (%p869_p0), %s177_s29, 128  }
  0x66   : > { %576 = vsyncadd (%p869_p0), %s177_s29, 4294967168  ;;  %p870_p11 = scmp.eq.s32.totalorder %s646_s16, 0 }
  0x68   : > { %578 = dma.done.wait (%p870_p11), [#allocation6], 256   ;;  %p871_p9 = pmov %p870_p11 }
  0x69   : > { %v211_v0 = vld [vmem:[%s180_s30] sm:$0xff]  ;;  %v248_v32 = vld [vmem:[#allocation5] sm:$0xff]  ;;  %v250_v34 = vld [vmem:[#allocation7] sm:$0xff]  ;;  %s369_s18 = sshll.u32 %s646_s16, 7  ;;  %s210_s20 = scalar_lea.vmem [#allocation8], %s364_s27 }
  0x6a   : > { %580 = vsyncadd (%p871_p9), [#allocation6], 4294967040  ;;  %v212_v1 = vrot.slane %v211_v0, 4  ;;  %v218_v2 = vmul.f32 %v211_v0, %v211_v0  ;;  %s267_s24 = sshll.u32 %s210_s20, 4  ;;  %s810_s28 = scalar_lea.hbm %s857_s3, %s369_s18  ;;  %s812_s24 = int_to_ptr.vmem [resolvable:$true] %s267_s24 }
  0x6b   : > { %s254_s22 = scalar_lea.sflag [#allocation4], %s790_s17  ;;  %s529_s4 = scalar_lea.vmem %s812_s24, 128 }
  0x6c   : > { %v213_v3 = vadd.f32 %v212_v1, %v211_v0  ;;  %v219_v4 = vrot.slane %v218_v2, 4  ;;  %p530_p2 = scmp.ne.s32.totalorder %s812_s24, %s529_s4  ;;  %s604_s16 = smov [#allocation8]  }
  0x6d   : > { %s533_s5 = sshll.u32 %s604_s16, 4  ;;  %s534_s5 = int_to_ptr.vmem [resolvable:$false] %s533_s5 }
  0x6e   : > { %v214_v5 = vrot.slane %v213_v3, 2  ;;  %v220_v6 = vadd.f32 %v219_v4, %v218_v2  ;;  %p531_p1 = pnand %p530_p2, %p744_p6  ;;  %s535_s6 = scalar_lea.vmem %s534_s5, 256 }
  0x6f   : > { %p536_p8 = scmp.lt.s32.totalorder %s812_s24, %s534_s5  ;;  %p537_p12 = scmp.lt.s32.totalorder %s535_s6, %s529_s4 }
  0x70   : > { %v215_v7 = vadd.f32 %v214_v5, %v213_v3  ;;  %v221_v8 = vrot.slane %v220_v6, 2  ;;  %p532_p4 = pneg %p531_p1 }
  0x71   : > { %p538_p3 = por %p537_p12, %p536_p8 }
  0x72   : > { %v216_v9 = vrot.slane %v215_v7, 1  ;;  %v222_v10 = vadd.f32 %v221_v8, %v220_v6 }
  0x73   : > { %p539_p7 = pnand %p538_p3, %p532_p4 }
  0x74   : > { %v217_v11 = vadd.f32 %v216_v9, %v215_v7  ;;  %v223_v12 = vrot.slane %v222_v10, 1 }
  0x76   : > { %225 = vadd.xlane.f32.xlu0 %v217_v11  ;;  %v224_v13 = vadd.f32 %v223_v12, %v222_v10 }
  0x7a   : > { %227 = vadd.xlane.f32.xlu0 %v224_v13 }
 0x103   : > { %v226_v14 = vpop.xlane.xlu0 %225 }
 0x104   : > { %v229_v15 = vmul.f32 0.0009765625, %v226_v14 }
 0x106   : > { %v230_v16 = vmul.f32 %v229_v15, %v226_v14  ;;  %v246_v30 = vsub.f32 %v211_v0, %v229_v15 }
 0x107   : > { %v228_v17 = vpop.xlane.xlu0 %227 }
 0x108   : > { %v231_v18 = vsub.f32 %v228_v17, %v230_v16 }
 0x10a   : > { %v232_v19 = vmul.f32 0.0009775171, %v231_v18 }
 0x10c   : > { %v233_v20 = vmax.f32 %v232_v19, 0.0 }
 0x10e   : > { %439 = vrsqrt.f32 %v233_v20  ;;  %vm236_vm0 = vcmp.eq.f32.partialorder %v233_v20, inf  ;;  %v239_v23 = vand.u32 2147483648, %v233_v20  ;;  %vm238_vm1 = vcmp.eq.f32.partialorder %v233_v20, 0.0 }
 0x118   : > { %v440_v21 = vpop.eup %439 }
 0x119   : > { %v235_v22 = vmul.f32 %v440_v21, %v233_v20 }
 0x11b   : > { %v237_v24 = vsel %vm236_vm0, %v233_v20, %v235_v22 }
 0x11c   : > { %v240_v25 = vsel %vm238_vm1, %v239_v23, %v237_v24 }
 0x11d   : > { %v241_v26 = vadd.f32 1e-08, %v240_v25 }
 0x11f   : > { %441 = vrcp.f32 %v241_v26 }
 0x129   : > { %v442_v27 = vpop.eup %441 }
 0x12a   : > { %v243_v28 = vmul.f32 %v442_v27, %v241_v26 }
 0x12c   : > { %v244_v29 = vsub.f32 2.0, %v243_v28 }
 0x12e   : > { %v245_v31 = vmul.f32 %v442_v27, %v244_v29 }
 0x130   : > { %v247_v33 = vmul.f32 %v246_v30, %v245_v31 }
 0x132   : > { %v249_v35 = vmul.f32 %v248_v32, %v247_v33 }
 0x134   : > { %v251_v36 = vadd.f32 %v250_v34, %v249_v35 }
 0x136   : > { %252 = vst [vmem:[%s210_s20] sm:$0xff] %v251_v36 }
 0x137   : > { %542 = shalt.err (!%p539_p7)
}
 0x138   : > { %s543_s8 = scalar_lea.hbm %s810_s28, 128  ;;  %s547_s11 = scalar_lea.hbm %s857_s3, 256 }
 0x139   : > { %p544_p10 = scmp.ne.s32.totalorder %s810_s28, %s543_s8  ;;  %p548_p0 = scmp.lt.u32.totalorder %s810_s28, %s857_s3 }
 0x13a   : > { %p549_p11 = scmp.lt.u32.totalorder %s547_s11, %s543_s8  ;;  %p551_p2 = scmp.lt.u32.totalorder %s543_s8, %s810_s28 }
 0x13b   : > { %p545_p13 = pnand %p544_p10, %p744_p6 }
 0x13c   : > { %p550_p9 = por %p549_p11, %p548_p0 }
 0x13d   : > { %p546_p5 = pneg %p545_p13 }
 0x13e   : > { %p552_p1 = por %p551_p2, %p550_p9 }
 0x140   : > { %p553_p4 = pnand %p552_p1, %p546_p5 }
 0x142   : > { %556 = shalt.err (!%p553_p4)
}
 0x143   : > { %382 = dma.vmem_to_hbm [thread:$0]  (%p744_p6), %s812_s24, 128, %s810_s28, %s254_s22  }
 0x144 PF: > { %s279_s29 = sand.u32 1, %s587_s12   ;;  %p872_p8 = scmp.ne.s32.totalorder %s862_s19, 0 }
 0x145   : > { %p873_p12 = scmp.ge.s32.totalorder %s599_s15, 2  ;;  %s280_s30 = scalar_lea.sflag [#allocation4], %s279_s29 }
 0x147   : > { %p396_p3 = pnand %p873_p12, %p872_p8 }
 0x149   : > { %582 = dma.done.wait (!%p396_p3), %s280_s30, 128  }
 0x14a   : > { %584 = vsyncadd (!%p396_p3), %s280_s30, 4294967168  ;;  %p17_p7 = scmp.ge.s32.totalorder %s681_s26, 4   ;;  %s874_s12 = smov %s591_s13 }
 0x14b   : > { %s875_s13 = smov %s595_s14  ;;  %s876_s14 = smov %s740_s25 }
 0x14c   : > { %s877_s15 = smov %s681_s26  ;;  %19 = sbr.rel (!%p17_p7) target bundleno = 6 (0x6), region = 85 }
 0x153   :  { %285 = vsyncpa [#allocation3], 1 }
 0x154   :  { %287 = vsyncpa [#allocation3 + $0x1], 1 }
 0x155   :  { %288 = vsyncpa [#allocation6], 1 }
 0x156   :  { %289 = vsyncpa [#allocation4], 1 }
 0x157   :  { %291 = vsyncpa [#allocation4 + $0x1], 1 }

</bundles_post_ra>
